<compile_context>
chip_gen: v7x
topology: tpu7x:2x2x1
jax: 0.10.0
libtpu: 0.0.40
codegen_flags: <defaults>
</compile_context>

<pallas_src>
import functools

import jax
import jax.numpy as jnp
from jax.experimental import pallas as pl
from jax.experimental.pallas import tpu as pltpu


def _round_up(x, m):
    return (x + m - 1) // m * m


def policy_kernel(x_ref, w1_ref, b1_ref, w2_ref, b2_ref, out_ref, *, matmul_dtype):
    # fc1 + ReLU. `matmul_dtype` lets large configs feed the MXU bf16 inputs
    # (2x throughput on v6e/v7x) while always accumulating in f32.
    x = x_ref[...].astype(matmul_dtype)
    h = (
        jnp.dot(x, w1_ref[...].astype(matmul_dtype), preferred_element_type=jnp.float32)
        + b1_ref[...]
    )
    h = jnp.maximum(h, 0.0)
    # fc2 — hidden activation stays a kernel-internal value, never materialized
    # to an output ref (the only narrow store is the (TB, action_size) result).
    logits = (
        jnp.dot(
            h.astype(matmul_dtype),
            w2_ref[...].astype(matmul_dtype),
            preferred_element_type=jnp.float32,
        )
        + b2_ref[...]
    )
    # Numerically-stable softmax along the action axis.
    m = jnp.max(logits, axis=-1, keepdims=True)
    e = jnp.exp(logits - m)
    denom = jnp.sum(e, axis=-1, keepdims=True)
    # EUP approximate reciprocal (free slot) + one Newton step so full f32
    # accuracy is preserved (keeps the 1e-5 tolerance valid).
    r = pl.reciprocal(denom, approx=True)
    r = r * (2.0 - denom * r)
    out_ref[...] = (e * r).astype(out_ref.dtype)


def policy_network_forward(x, w1, b1, w2, b2, *, block_b=256, matmul_dtype=jnp.float32):
    """x: (B, input_size) f32. Returns (B, action_size) f32 action probabilities.

    Batch dimension is tiled with a grid of (padded_B // TB,) steps:
      - x / out stream one (TB, *) tile per step (Pallas double-buffers the DMAs),
      - w1/b1/w2/b2 index_maps return the same block every step, so the weights
        are fetched once and stay resident in VMEM,
      - the grid axis is marked "parallel" so v7x's two TensorCores split the
        batch (harmless on single-TC v5e/v6e).
    For large layers, pass matmul_dtype=jnp.bfloat16 to double MXU throughput
    on v6e/v7x (f32 accumulation and f32 bias/softmax epilogue are kept).
    """
    B, input_size = x.shape
    hidden_size = w1.shape[1]
    action_size = w2.shape[1]

    # Batch tile: multiple of 8 (f32 sublane), capped at block_b (default 256,
    # sized for the 256-wide MXU on v6e/v7x; still a 128-multiple for v5e).
    tb = min(block_b, _round_up(B, 8))
    padded_b = _round_up(B, tb)
    if padded_b != B:
        # Zero-padded rows produce finite softmax rows; they are sliced off below.
        x = jnp.pad(x, ((0, padded_b - B), (0, 0)))
    grid = (padded_b // tb,)

    kernel = functools.partial(policy_kernel, matmul_dtype=matmul_dtype)

    out = pl.pallas_call(
        kernel,
        out_shape=jax.ShapeDtypeStruct((padded_b, action_size), jnp.float32),
        grid=grid,
        in_specs=[
            # Activations: one batch tile per grid step.
            pl.BlockSpec((tb, input_size), lambda i: (i, 0)),
            # Weights / biases: same block every step -> VMEM-resident, no
            # per-step weight DMA in the steady-state pipeline.
            pl.BlockSpec((input_size, hidden_size), lambda i: (0, 0)),
            pl.BlockSpec((1, hidden_size), lambda i: (0, 0)),
            pl.BlockSpec((hidden_size, action_size), lambda i: (0, 0)),
            pl.BlockSpec((1, action_size), lambda i: (0, 0)),
        ],
        out_specs=pl.BlockSpec((tb, action_size), lambda i: (i, 0)),
        compiler_params=pltpu.CompilerParams(
            dimension_semantics=("parallel",),
        ),
    )(x, w1, b1, w2, b2)

    return out[:B] if padded_b != B else out


def init_params(key, input_size, hidden_size, action_size):
    """Deterministic init mimicking nn.Linear default (uniform +-1/sqrt(fan_in))."""
    k1, k2, k3, k4 = jax.random.split(key, 4)
    lim1 = 1.0 / jnp.sqrt(jnp.float32(input_size))
    lim2 = 1.0 / jnp.sqrt(jnp.float32(hidden_size))
    w1 = jax.random.uniform(k1, (input_size, hidden_size), jnp.float32, -lim1, lim1)
    b1 = jax.random.uniform(k2, (1, hidden_size), jnp.float32, -lim1, lim1)
    w2 = jax.random.uniform(k3, (hidden_size, action_size), jnp.float32, -lim2, lim2)
    b2 = jax.random.uniform(k4, (1, action_size), jnp.float32, -lim2, lim2)
    return w1, b1, w2, b2


if __name__ == "__main__":
    key = jax.random.PRNGKey(0)
    kx, kp = jax.random.split(key)

    # Small shapes consistent with the module's forward: x is (batch, input_size).
    batch, input_size, hidden_size, action_size = 2, 16, 32, 4

    x = jax.random.normal(kx, (batch, input_size), jnp.float32)
    w1, b1, w2, b2 = init_params(kp, input_size, hidden_size, action_size)

    probs = policy_network_forward(x, w1, b1, w2, b2)
    probs = jax.block_until_ready(probs)

    # Sanity: reference in plain JAX, softmax rows sum to 1.
    h_ref = jnp.maximum(x @ w1 + b1, 0.0)
    logits_ref = h_ref @ w2 + b2
    ref = jax.nn.softmax(logits_ref, axis=-1)
    assert probs.shape == (batch, action_size)
    assert jnp.allclose(probs, ref, atol=1e-5, rtol=1e-5)
    assert jnp.allclose(jnp.sum(probs, axis=-1), 1.0, atol=1e-5)

    # Also exercise the batched/tiled path (multiple grid steps + remainder pad).
    big_b = 1000
    xb = jax.random.normal(jax.random.PRNGKey(1), (big_b, input_size), jnp.float32)
    probs_b = jax.block_until_ready(policy_network_forward(xb, w1, b1, w2, b2))
    ref_b = jax.nn.softmax(jnp.maximum(xb @ w1 + b1, 0.0) @ w2 + b2, axis=-1)
    assert probs_b.shape == (big_b, action_size)
    assert jnp.allclose(probs_b, ref_b, atol=1e-5, rtol=1e-5)

    print("KERNEL_OK")
</pallas_src>

<mosaic_0001>
module attributes {stable_mosaic.version = 11 : i64} {
  func.func @policy_kernel(%arg0: i32, %arg1: memref<8x16xf32, #tpu.memory_space<vmem>>, %arg2: memref<16x32xf32, #tpu.memory_space<vmem>>, %arg3: memref<1x32xf32, #tpu.memory_space<vmem>>, %arg4: memref<32x4xf32, #tpu.memory_space<vmem>>, %arg5: memref<1x4xf32, #tpu.memory_space<vmem>>, %arg6: memref<8x4xf32, #tpu.memory_space<vmem>>) attributes {dimension_semantics = [#tpu.dimension_semantics<parallel>], iteration_bounds = array<i64: 1>, scalar_prefetch = 0 : i64, scratch_operands = 0 : i64, tpu.core_type = #tpu.core_type<tc>, window_params = [{transform_indices = @transform_0, window_bounds = array<i64: 8, 16>}, {pipeline_mode = #tpu.pipeline_mode<synchronous>, transform_indices = @transform_1, window_bounds = array<i64: 16, 32>}, {pipeline_mode = #tpu.pipeline_mode<synchronous>, transform_indices = @transform_2, window_bounds = array<i64: 1, 32>}, {pipeline_mode = #tpu.pipeline_mode<synchronous>, transform_indices = @transform_3, window_bounds = array<i64: 32, 4>}, {pipeline_mode = #tpu.pipeline_mode<synchronous>, transform_indices = @transform_4, window_bounds = array<i64: 1, 4>}, {transform_indices = @transform_5, window_bounds = array<i64: 8, 4>}]} {
    %c0 = arith.constant 0 : index
    %c0_0 = arith.constant 0 : index
    %0 = vector.load %arg1[%c0, %c0_0] : memref<8x16xf32, #tpu.memory_space<vmem>>, vector<8x16xf32>
    %c0_1 = arith.constant 0 : index
    %c0_2 = arith.constant 0 : index
    %1 = vector.load %arg2[%c0_1, %c0_2] : memref<16x32xf32, #tpu.memory_space<vmem>>, vector<16x32xf32>
    %cst = arith.constant dense<0.000000e+00> : vector<8x32xf32>
    %2 = tpu.matmul %0, %1, %cst {dimension_numbers = #tpu.dot_dimension_numbers<[1], [0], [0], [1], [0, 0, 1, 1], [], []>} : vector<8x16xf32>, vector<16x32xf32>, vector<8x32xf32> -> vector<8x32xf32>
    %c0_3 = arith.constant 0 : index
    %c0_4 = arith.constant 0 : index
    %3 = vector.load %arg3[%c0_3, %c0_4] : memref<1x32xf32, #tpu.memory_space<vmem>>, vector<1x32xf32>
    %4 = vector.broadcast %3 : vector<1x32xf32> to vector<8x32xf32>
    %5 = arith.addf %2, %4 : vector<8x32xf32>
    %cst_5 = arith.constant 0.000000e+00 : f32
    %6 = vector.broadcast %cst_5 : f32 to vector<8x32xf32>
    %7 = arith.maximumf %5, %6 : vector<8x32xf32>
    %c0_6 = arith.constant 0 : index
    %c0_7 = arith.constant 0 : index
    %8 = vector.load %arg4[%c0_6, %c0_7] : memref<32x4xf32, #tpu.memory_space<vmem>>, vector<32x4xf32>
    %cst_8 = arith.constant dense<0.000000e+00> : vector<8x4xf32>
    %9 = tpu.matmul %7, %8, %cst_8 {dimension_numbers = #tpu.dot_dimension_numbers<[1], [0], [0], [1], [0, 0, 1, 1], [], []>} : vector<8x32xf32>, vector<32x4xf32>, vector<8x4xf32> -> vector<8x4xf32>
    %c0_9 = arith.constant 0 : index
    %c0_10 = arith.constant 0 : index
    %10 = vector.load %arg5[%c0_9, %c0_10] : memref<1x4xf32, #tpu.memory_space<vmem>>, vector<1x4xf32>
    %11 = vector.broadcast %10 : vector<1x4xf32> to vector<8x4xf32>
    %12 = arith.addf %9, %11 : vector<8x4xf32>
    %cst_11 = arith.constant dense<0xFF800000> : vector<8xf32>
    %13 = vector.multi_reduction <maximumf>, %12, %cst_11 [1] : vector<8x4xf32> to vector<8xf32>
    %14 = vector.shape_cast %13 : vector<8xf32> to vector<8x1xf32>
    %15 = vector.broadcast %14 : vector<8x1xf32> to vector<8x4xf32>
    %16 = arith.subf %12, %15 : vector<8x4xf32>
    %17 = math.exp %16 : vector<8x4xf32>
    %cst_12 = arith.constant dense<0.000000e+00> : vector<8xf32>
    %18 = vector.multi_reduction <add>, %17, %cst_12 [1] : vector<8x4xf32> to vector<8xf32>
    %19 = vector.shape_cast %18 : vector<8xf32> to vector<8x1xf32>
    %20 = tpu.reciprocal %19 {approx = true} : vector<8x1xf32> -> vector<8x1xf32>
    %21 = arith.mulf %19, %20 : vector<8x1xf32>
    %cst_13 = arith.constant 2.000000e+00 : f32
    %22 = vector.broadcast %cst_13 : f32 to vector<8x1xf32>
    %23 = arith.subf %22, %21 : vector<8x1xf32>
    %24 = arith.mulf %20, %23 : vector<8x1xf32>
    %25 = vector.broadcast %24 : vector<8x1xf32> to vector<8x4xf32>
    %26 = arith.mulf %17, %25 : vector<8x4xf32>
    %c0_14 = arith.constant 0 : index
    %c0_15 = arith.constant 0 : index
    %27 = vector.load %arg6[%c0_14, %c0_15] : memref<8x4xf32, #tpu.memory_space<vmem>>, vector<8x4xf32>
    tpu.vector_store %arg6[%c0_14, %c0_15], %26 {strides = array<i32>} : memref<8x4xf32, #tpu.memory_space<vmem>>, vector<8x4xf32>,
    return
  }
  func.func @transform_0(%arg0: i32) -> (i32, i32) {
    %c0_i32 = arith.constant 0 : i32
    %c0_i32_0 = arith.constant 0 : i32
    return %arg0, %c0_i32 : i32, i32
  }
  func.func @transform_1(%arg0: i32) -> (i32, i32) {
    %c0_i32 = arith.constant 0 : i32
    %c0_i32_0 = arith.constant 0 : i32
    %c0_i32_1 = arith.constant 0 : i32
    return %c0_i32, %c0_i32_0 : i32, i32
  }
  func.func @transform_2(%arg0: i32) -> (i32, i32) {
    %c0_i32 = arith.constant 0 : i32
    %c0_i32_0 = arith.constant 0 : i32
    %c0_i32_1 = arith.constant 0 : i32
    return %c0_i32, %c0_i32_0 : i32, i32
  }
  func.func @transform_3(%arg0: i32) -> (i32, i32) {
    %c0_i32 = arith.constant 0 : i32
    %c0_i32_0 = arith.constant 0 : i32
    %c0_i32_1 = arith.constant 0 : i32
    return %c0_i32, %c0_i32_0 : i32, i32
  }
  func.func @transform_4(%arg0: i32) -> (i32, i32) {
    %c0_i32 = arith.constant 0 : i32
    %c0_i32_0 = arith.constant 0 : i32
    %c0_i32_1 = arith.constant 0 : i32
    return %c0_i32, %c0_i32_0 : i32, i32
  }
  func.func @transform_5(%arg0: i32) -> (i32, i32) {
    %c0_i32 = arith.constant 0 : i32
    %c0_i32_0 = arith.constant 0 : i32
    return %arg0, %c0_i32 : i32, i32
  }
}

</mosaic_0001>

<bundles_post_ra>
// kernel: tpu_custom_call.1
= control target key start
LH: loop header
LB: loop body
LE: loop exit
PB: predicated region body
PF: predicated region fallthrough
CT: control target
= control target key end

     0   :  { %v256_v0 = vmov 0.0|0.0   ;;  %vm257_vm0 = vmmov 0   ;;  %v258_v3 = vmov 0.0   ;;  %vm30_vm1 = vcmask 130048   ;;  %s322_s1 = inlined_call_operand.vmem [shape: f32[16,32], index: 1, kind: input, shape index: {}]   ;;  %s323_s3 = inlined_call_operand.vmem [shape: f32[32,4], index: 3, kind: input, shape index: {}]   ;;  %s324_s0 = inlined_call_operand.vmem [shape: f32[8,16], index: 0, kind: input, shape index: {}]   ;;  %s325_s2 = inlined_call_operand.vmem [shape: f32[1,32], index: 2, kind: input, shape index: {}]   ;;  %s326_s4 = inlined_call_operand.vmem [shape: f32[1,4], index: 4, kind: input, shape index: {}]   ;;  %s327_s5 = inlined_call_operand.vmem [shape: f32[8,4], index: 5, kind: output, shape index: {}]  }
   0x1   :  { %240 = vmatprep.subr.bf16.mxu0 %v256_v0  ;;  %v21_v1 = vld [vmem:[%s322_s1] sm:$0xff]  ;;  %v22_v2 = vld [vmem:[%s322_s1 + $0x8] sm:$0xff]  ;;  %226 = vmatprep.mubr.msk.f32.mxu0 %vm257_vm0, %v258_v3  ;;  %v107_v9 = vld [vmem:[%s323_s3 + $0x10] sm:$0xff]  ;;  %vm116_vm2 = vcmask 261120   ;;  %vm190_vm3 = vcmask 31744  }
   0x2   :  { %v241_v4 = vpack.c.bf16 %v22_v2, %v21_v1  ;;  %243 = vmatprep.subr.bf16.mxu1 %v256_v0  ;;  %v105_v5 = vld [vmem:[%s323_s3] sm:$0xff]  ;;  %v106_v6 = vld [vmem:[%s323_s3 + $0x8] sm:$0xff]  ;;  %237 = vmatprep.mubr.msk.f32.mxu1 %vm257_vm0, %v258_v3  ;;  %v108_v10 = vld [vmem:[%s323_s3 + $0x18] sm:$0xff] }
   0x3   :  { %v244_v7 = vpack.c.bf16 %v106_v6, %v105_v5  ;;  %v20_v8 = vld [vmem:[%s324_s0] sm:$0xff]  ;;  %v247_v11 = vpack.c.bf16 %v108_v10, %v107_v9 }
   0x4   :  { %242 = vmatpush3.bf16.msra.mxu0 %v241_v4  ;;  %v210_v12 = vld [vmem:[%s325_s2] ss:$0 sm:$0xff] }
   0x5   :  { %245 = vmatpush3.bf16.msra.mxu1 %v244_v7  ;;  %v212_v17 = vld [vmem:[%s326_s4] ss:$0 sm:$0xff] }
   0x6   :  { %246 = vmatprep.subr.bf16.mxu1 %v256_v0 }
   0x7   :  { %227 = vmatmul.mubr.msk.f32.vlgmr.msra.gmra.mrb[0].mxu0 %vm30_vm1, %v20_v8 }
   0x9   :  { %248 = vmatpush3.bf16.msra.mxu1 %v247_v11 }
  0xda   :  { %v100_v13 = vpop.f32.mrb[0].mxu0 }
  0xdb   :  { %v101_v14 = vadd.f32 %v210_v12, %v100_v13  ;;  %v228_v15 = vpop.f32.mrb[1].mxu0 }
  0xdd   :  { %v104_v16 = vmax.f32 %v101_v14, 0.0 }
  0xdf   :  { %238 = vmatmul.mubr.msk.f32.vlgmr.msra.gmra.mrb[0].mxu1 %vm116_vm2, %v104_v16 }
 0x1b2   :  { %v186_v18 = vpop.f32.mrb[0].mxu1 }
 0x1b3   :  { %v187_v19 = vadd.f32 %v212_v17, %v186_v18  ;;  %v239_v20 = vpop.f32.mrb[1].mxu1 }
 0x1b5   :  { %v191_v21 = vsel %vm190_vm3, %v187_v19, -inf }
 0x1b6   :  { %192 = vmax.xlane.f32.xlu0 %v191_v21 }
 0x243   :  { %v193_v22 = vpop.xlane.xlu0 %192 }
 0x244   :  { %v194_v23 = vsub.f32 %v187_v19, %v193_v22 }
 0x246   :  { %v195_v24 = vmul.f32 1.442695, %v194_v23 }
 0x248   :  { %252 = vpow2.f32 %v195_v24 }
 0x252   :  { %v253_v25 = vpop.eup %252 }
 0x253   :  { %v197_v26 = vsel %vm190_vm3, %v253_v25, 0.0 }
 0x254   :  { %198 = vadd.xlane.f32.xlu0 %v197_v26 }
 0x2e1   :  { %v199_v27 = vpop.xlane.xlu0 %198 }
 0x2e2   :  { %254 = vrcp.f32 %v199_v27 }
 0x2ec   :  { %v255_v28 = vpop.eup %254 }
 0x2ed   :  { %v201_v29 = vmul.f32 %v255_v28, %v199_v27 }
 0x2ef   :  { %v202_v30 = vsub.f32 2.0, %v201_v29 }
 0x2f1   :  { %v203_v31 = vmul.f32 %v255_v28, %v202_v30 }
 0x2f3   :  { %v204_v32 = vmul.f32 %v253_v25, %v203_v31 }
 0x2f5   :  { %205 = vst.msk [vmem:[%s327_s5] sm:$0xff] %vm190_vm3, %v204_v32 }

</bundles_post_ra>
